<compile_context>
chip_gen: v5e
topology: v5e:2x2
jax: 0.10.0
libtpu: 0.0.40
codegen_flags: <defaults>
</compile_context>

<pallas_src>
import math

import jax
import jax.numpy as jnp
from jax.experimental import pallas as pl
from jax.experimental.pallas import tpu as pltpu

_HALF_PI = 0.5 * math.pi

# Cephes single-precision minimax coefficients, valid on [-pi/4, pi/4].
_S3 = -1.6666654611e-1
_S5 = 8.3321608736e-3
_S7 = -1.9515295891e-4
_C4 = 4.166664568298827e-2
_C6 = -1.388731625493765e-3
_C8 = 2.443315711809948e-5


def _fourier_embed_kernel(t_ref, w4_ref, o_ref):
    # t_ref: (TB, 1) f32 times; w4_ref: (1, D/2) f32 = 4*W; o_ref: (TB, D)
    d_half = w4_ref.shape[-1]

    # Angle in quarter turns: theta = 2*pi*t*W = (pi/2) * u,  u = t * (4*W).
    u = t_ref[...] * w4_ref[...]                      # (TB, D/2) VPU broadcast

    # --- shared range reduction (done once for both sin and cos) ---------
    # Valid for |u| << 2^23 (here |u| <~ 5e2). floor(u+0.5) == nearest int.
    n = jnp.floor(u + 0.5)                            # nearest quarter turn
    d = u - n                                         # exact (Sterbenz), |d| <= 0.5
    r = d * _HALF_PI                                  # residual in [-pi/4, pi/4]
    z = r * r

    # --- short polynomials on the reduced argument -----------------------
    sin_r = r + r * z * (_S3 + z * (_S5 + z * _S7))
    cos_r = 1.0 - 0.5 * z + (z * z) * (_C4 + z * (_C6 + z * _C8))

    # --- quadrant selection: theta = r + q*(pi/2), q = n mod 4 -----------
    q = n.astype(jnp.int32)
    swap = (q & 1) == 1
    s_base = jnp.where(swap, cos_r, sin_r)
    c_base = jnp.where(swap, sin_r, cos_r)
    s_neg = (q & 2) != 0                              # sin negative for q in {2,3}
    c_neg = ((q + 1) & 2) != 0                        # cos negative for q in {1,2}
    sin_out = jnp.where(s_neg, -s_base, s_base)
    cos_out = jnp.where(c_neg, -c_base, c_base)

    # Lane-dense half stores (d_half % 128 == 0 -> unmasked vst).
    o_ref[:, :d_half] = sin_out.astype(o_ref.dtype)
    o_ref[:, d_half:] = cos_out.astype(o_ref.dtype)


def _round_up(x: int, m: int) -> int:
    return ((x + m - 1) // m) * m


def gaussian_fourier_time_embedding(
    times: jax.Array,
    W: jax.Array,
    *,
    block_b: int = 8192,
    out_dtype=jnp.float32,
) -> jax.Array:
    """times: (B,) or (B,1); W: (embed_dim//2,). Returns (B, embed_dim)."""
    times_col = jnp.reshape(times, (-1, 1)).astype(jnp.float32)   # (B, 1)
    w_row = jnp.reshape(W, (1, -1)).astype(jnp.float32)           # (1, D/2)
    b = times_col.shape[0]
    d_half = w_row.shape[1]
    d = 2 * d_half

    # Lane-density requirement for unmasked half stores (embed_dim % 256 == 0).
    if d_half % 128 != 0:
        raise ValueError(
            f"embed_dim//2 = {d_half} must be a multiple of 128 for the "
            "lane-dense Pallas kernel (default embed_dim=256 satisfies this).")

    # Fold the constant into W once (setup-time, exact power-of-two scale):
    # the kernel works in quarter-turn units, theta = (pi/2) * (t * 4W).
    w4 = w_row * 4.0

    # Batch tile: sublane-aligned, capped at block_b.
    tb = min(block_b, _round_up(b, 8))
    b_pad = _round_up(b, tb)
    if b_pad != b:
        # Padded rows compute sin(0)/cos(0) and are sliced off below.
        times_col = jnp.pad(times_col, ((0, b_pad - b), (0, 0)))

    # VMEM budget, double-buffered by the pipeline:
    #   out tiles:   2 * tb * d * 4 B
    #   times tiles: 2 * tb * 128 * 4 B   ((tb,1) block lane-pads to 128)
    #   w4 tiles:    2 * 8 * d_half * 4 B
    vmem_bytes = 2 * tb * d * 4 + 2 * tb * 128 * 4 + 2 * 8 * d_half * 4
    vmem_limit = min(vmem_bytes + (8 << 20), 56 << 20)  # headroom; < v7x 64 MiB

    out = pl.pallas_call(
        _fourier_embed_kernel,
        out_shape=jax.ShapeDtypeStruct((b_pad, d), out_dtype),
        grid=(b_pad // tb,),
        in_specs=[
            pl.BlockSpec((tb, 1), lambda i: (i, 0)),       # times tile
            pl.BlockSpec((1, d_half), lambda i: (0, 0)),   # 4*W, resident
        ],
        out_specs=pl.BlockSpec((tb, d), lambda i: (i, 0)),
        compiler_params=pltpu.CompilerParams(
            dimension_semantics=("parallel",),
            vmem_limit_bytes=vmem_limit),
    )(times_col, w4)

    return out[:b] if b_pad != b else out


if __name__ == "__main__":
    embed_dim = 256
    scale = 30.0
    batch = 8

    key = jax.random.PRNGKey(0)
    k_w, k_t = jax.random.split(key)

    # Same shape/init as the (non-trainable) nn.Parameter: randn(D/2) * scale.
    W = jax.random.normal(k_w, (embed_dim // 2,), dtype=jnp.float32) * scale
    # Time steps in (0, 1], typical for score matching.
    times = jax.random.uniform(k_t, (batch,), dtype=jnp.float32)

    out = jax.block_until_ready(gaussian_fourier_time_embedding(times, W))

    # Pure-JAX reference of the PyTorch forward. Tolerance covers the fact
    # that the kernel's exact mod-(quarter-turn) reduction of t*W is slightly
    # *more* accurate than reducing the large radian argument fl(t*W*2pi).
    proj_ref = times[:, None] * W[None, :] * (2.0 * math.pi)
    ref = jnp.concatenate([jnp.sin(proj_ref), jnp.cos(proj_ref)], axis=-1)

    assert out.shape == (batch, embed_dim), out.shape
    assert out.dtype == jnp.float32, out.dtype
    assert jnp.allclose(out, ref, atol=5e-4, rtol=1e-5), "mismatch vs reference"

    # Exercise the multi-tile grid + tail-padding path (B not multiple of 8).
    times2 = jax.random.uniform(jax.random.PRNGKey(1), (13,), dtype=jnp.float32)
    out2 = jax.block_until_ready(
        gaussian_fourier_time_embedding(times2, W, block_b=8))
    proj2 = times2[:, None] * W[None, :] * (2.0 * math.pi)
    ref2 = jnp.concatenate([jnp.sin(proj2), jnp.cos(proj2)], axis=-1)
    assert out2.shape == (13, embed_dim), out2.shape
    assert jnp.allclose(out2, ref2, atol=5e-4, rtol=1e-5), "mismatch (tail path)"

    print("KERNEL_OK")
</pallas_src>

<mosaic_0001>
module attributes {stable_mosaic.version = 11 : i64} {
  func.func @_fourier_embed_kernel(%arg0: i32, %arg1: memref<8x1xf32, #tpu.memory_space<vmem>>, %arg2: memref<1x128xf32, #tpu.memory_space<vmem>>, %arg3: memref<8x256xf32, #tpu.memory_space<vmem>>) attributes {dimension_semantics = [#tpu.dimension_semantics<parallel>], iteration_bounds = array<i64: 1>, scalar_prefetch = 0 : i64, scratch_operands = 0 : i64, tpu.core_type = #tpu.core_type<tc>, window_params = [{transform_indices = @transform_0, window_bounds = array<i64: 8, 1>}, {pipeline_mode = #tpu.pipeline_mode<synchronous>, transform_indices = @transform_1, window_bounds = array<i64: 1, 128>}, {transform_indices = @transform_2, window_bounds = array<i64: 8, 256>}]} {
    %c0 = arith.constant 0 : index
    %c0_0 = arith.constant 0 : index
    %0 = vector.load %arg1[%c0, %c0_0] : memref<8x1xf32, #tpu.memory_space<vmem>>, vector<8x1xf32>
    %c0_1 = arith.constant 0 : index
    %c0_2 = arith.constant 0 : index
    %1 = vector.load %arg2[%c0_1, %c0_2] : memref<1x128xf32, #tpu.memory_space<vmem>>, vector<1x128xf32>
    %2 = vector.broadcast %0 : vector<8x1xf32> to vector<8x128xf32>
    %3 = vector.broadcast %1 : vector<1x128xf32> to vector<8x128xf32>
    %4 = arith.mulf %2, %3 : vector<8x128xf32>
    %cst = arith.constant 5.000000e-01 : f32
    %5 = vector.broadcast %cst : f32 to vector<8x128xf32>
    %6 = arith.addf %4, %5 : vector<8x128xf32>
    %7 = math.floor %6 : vector<8x128xf32>
    %8 = arith.subf %4, %7 : vector<8x128xf32>
    %cst_3 = arith.constant 1.57079637 : f32
    %9 = vector.broadcast %cst_3 : f32 to vector<8x128xf32>
    %10 = arith.mulf %8, %9 : vector<8x128xf32>
    %11 = arith.mulf %10, %10 : vector<8x128xf32>
    %12 = arith.mulf %10, %11 : vector<8x128xf32>
    %cst_4 = arith.constant -1.95152956E-4 : f32
    %13 = vector.broadcast %cst_4 : f32 to vector<8x128xf32>
    %14 = arith.mulf %11, %13 : vector<8x128xf32>
    %cst_5 = arith.constant 0.00833216123 : f32
    %15 = vector.broadcast %cst_5 : f32 to vector<8x128xf32>
    %16 = arith.addf %15, %14 : vector<8x128xf32>
    %17 = arith.mulf %11, %16 : vector<8x128xf32>
    %cst_6 = arith.constant -0.166666552 : f32
    %18 = vector.broadcast %cst_6 : f32 to vector<8x128xf32>
    %19 = arith.addf %18, %17 : vector<8x128xf32>
    %20 = arith.mulf %12, %19 : vector<8x128xf32>
    %21 = arith.addf %10, %20 : vector<8x128xf32>
    %cst_7 = arith.constant 5.000000e-01 : f32
    %22 = vector.broadcast %cst_7 : f32 to vector<8x128xf32>
    %23 = arith.mulf %22, %11 : vector<8x128xf32>
    %cst_8 = arith.constant 1.000000e+00 : f32
    %24 = vector.broadcast %cst_8 : f32 to vector<8x128xf32>
    %25 = arith.subf %24, %23 : vector<8x128xf32>
    %26 = arith.mulf %11, %11 : vector<8x128xf32>
    %cst_9 = arith.constant 2.44331568E-5 : f32
    %27 = vector.broadcast %cst_9 : f32 to vector<8x128xf32>
    %28 = arith.mulf %11, %27 : vector<8x128xf32>
    %cst_10 = arith.constant -0.00138873165 : f32
    %29 = vector.broadcast %cst_10 : f32 to vector<8x128xf32>
    %30 = arith.addf %29, %28 : vector<8x128xf32>
    %31 = arith.mulf %11, %30 : vector<8x128xf32>
    %cst_11 = arith.constant 0.0416666456 : f32
    %32 = vector.broadcast %cst_11 : f32 to vector<8x128xf32>
    %33 = arith.addf %32, %31 : vector<8x128xf32>
    %34 = arith.mulf %26, %33 : vector<8x128xf32>
    %35 = arith.addf %25, %34 : vector<8x128xf32>
    %36 = arith.fptosi %7 : vector<8x128xf32> to vector<8x128xi32>
    %c1_i32 = arith.constant 1 : i32
    %37 = vector.broadcast %c1_i32 : i32 to vector<8x128xi32>
    %38 = arith.andi %36, %37 : vector<8x128xi32>
    %c1_i32_12 = arith.constant 1 : i32
    %39 = vector.broadcast %c1_i32_12 : i32 to vector<8x128xi32>
    %40 = arith.cmpi eq, %38, %39 : vector<8x128xi32>
    %41 = arith.select %40, %35, %21 : vector<8x128xi1>, vector<8x128xf32>
    %42 = arith.select %40, %21, %35 : vector<8x128xi1>, vector<8x128xf32>
    %c2_i32 = arith.constant 2 : i32
    %43 = vector.broadcast %c2_i32 : i32 to vector<8x128xi32>
    %44 = arith.andi %36, %43 : vector<8x128xi32>
    %c0_i32 = arith.constant 0 : i32
    %45 = vector.broadcast %c0_i32 : i32 to vector<8x128xi32>
    %46 = arith.cmpi ne, %44, %45 : vector<8x128xi32>
    %c1_i32_13 = arith.constant 1 : i32
    %47 = vector.broadcast %c1_i32_13 : i32 to vector<8x128xi32>
    %48 = arith.addi %36, %47 : vector<8x128xi32>
    %c2_i32_14 = arith.constant 2 : i32
    %49 = vector.broadcast %c2_i32_14 : i32 to vector<8x128xi32>
    %50 = arith.andi %48, %49 : vector<8x128xi32>
    %c0_i32_15 = arith.constant 0 : i32
    %51 = vector.broadcast %c0_i32_15 : i32 to vector<8x128xi32>
    %52 = arith.cmpi ne, %50, %51 : vector<8x128xi32>
    %cst_16 = arith.constant 0.000000e+00 : f32
    %53 = vector.broadcast %cst_16 : f32 to vector<8x128xf32>
    %54 = arith.subf %53, %41 : vector<8x128xf32>
    %55 = arith.select %46, %54, %41 : vector<8x128xi1>, vector<8x128xf32>
    %cst_17 = arith.constant 0.000000e+00 : f32
    %56 = vector.broadcast %cst_17 : f32 to vector<8x128xf32>
    %57 = arith.subf %56, %42 : vector<8x128xf32>
    %58 = arith.select %52, %57, %42 : vector<8x128xi1>, vector<8x128xf32>
    %c0_18 = arith.constant 0 : index
    %c0_19 = arith.constant 0 : index
    %59 = vector.load %arg3[%c0_18, %c0_19] : memref<8x256xf32, #tpu.memory_space<vmem>>, vector<8x128xf32>
    tpu.vector_store %arg3[%c0_18, %c0_19], %55 {strides = array<i32>} : memref<8x256xf32, #tpu.memory_space<vmem>>, vector<8x128xf32>,
    %c0_20 = arith.constant 0 : index
    %c128 = arith.constant 128 : index
    %60 = vector.load %arg3[%c0_20, %c128] : memref<8x256xf32, #tpu.memory_space<vmem>>, vector<8x128xf32>
    tpu.vector_store %arg3[%c0_20, %c128], %58 {strides = array<i32>} : memref<8x256xf32, #tpu.memory_space<vmem>>, vector<8x128xf32>,
    return
  }
  func.func @transform_0(%arg0: i32) -> (i32, i32) {
    %c0_i32 = arith.constant 0 : i32
    %c0_i32_0 = arith.constant 0 : i32
    return %arg0, %c0_i32 : i32, i32
  }
  func.func @transform_1(%arg0: i32) -> (i32, i32) {
    %c0_i32 = arith.constant 0 : i32
    %c0_i32_0 = arith.constant 0 : i32
    %c0_i32_1 = arith.constant 0 : i32
    return %c0_i32, %c0_i32_0 : i32, i32
  }
  func.func @transform_2(%arg0: i32) -> (i32, i32) {
    %c0_i32 = arith.constant 0 : i32
    %c0_i32_0 = arith.constant 0 : i32
    return %arg0, %c0_i32 : i32, i32
  }
}

</mosaic_0001>

<bundles_post_ra>
// kernel: tpu_custom_call.1
= control target key start
LH: loop header
LB: loop body
LE: loop exit
PB: predicated region body
PF: predicated region fallthrough
CT: control target
= control target key end

     0   :  { %v108_v1 = vmov 0   ;;  %s134_s0 = inlined_call_operand.vmem [shape: f32[8,1], index: 0, kind: input, shape index: {}]   ;;  %s135_s1 = inlined_call_operand.vmem [shape: f32[1,128], index: 1, kind: input, shape index: {}]   ;;  %s136_s2 = inlined_call_operand.hbm [shape: f32[8,256], index: 2, kind: output, shape index: {}]  }
   0x1   :  { %v12_v0 = vld [vmem:[%s134_s0] sm:$0xff]  ;;  %80 = vset.pattern.permute.xlu0 %v108_v1 }
   0x2   :  { %7 = vsyncpa [#allocation3], 0  ;;  %16 = vperm.xlu0 %80, %v12_v0   ;;  %v81_v2 = vld [vmem:[%s135_s1] ss:$0 sm:$0xff]  ;;  %s109_s0 = smov [#allocation2]   ;;  %s67_s15 = sshll.u32 %s136_s2, 4  ;;  %s68_s15 = int_to_ptr.hbm [resolvable:$true] %s67_s15 }
   0x3   :  { %s65_s1 = sshll.u32 %s109_s0, 4  ;;  %s66_s1 = int_to_ptr.vmem [resolvable:$true] %s65_s1 }
  0x74   :  { %v17_v3 = vpop.permute.xlu0 %16 }
  0x75   :  { %v22_v4 = vmul.f32 %v81_v2, %v17_v3 }
  0x77   :  { %v23_v5 = vadd.f32 0.5, %v22_v4 }
  0x79   :  { %v24_v6 = vfloor.f32 %v23_v5 }
  0x7b   :  { %v25_v7 = vsub.f32 %v22_v4, %v24_v6  ;;  %v77_v13 = vcvt.f32.s32 %v24_v6 }
  0x7d   :  { %v26_v8 = vmul.f32 1.5707964, %v25_v7  ;;  %v51_v22 = vadd.s32 1, %v77_v13  ;;  %v45_v24 = vand.u32 1, %v77_v13  ;;  %v49_v29 = vand.u32 2, %v77_v13 }
  0x7f   :  { %v27_v9 = vmul.f32 %v26_v8, %v26_v8  ;;  %v52_v30 = vand.u32 2, %v51_v22  ;;  %vm46_vm0 = vcmp.eq.s32.totalorder %v45_v24, 1  ;;  %vm50_vm1 = vcmp.ne.s32.totalorder %v49_v29, 0 }
  0x81   :  { %v29_v10 = vmul.f32 -0.00019515296, %v27_v9  ;;  %v38_v11 = vmul.f32 2.4433157e-05, %v27_v9  ;;  %v35_v16 = vmul.f32 0.5, %v27_v9  ;;  %v28_v18 = vmul.f32 %v27_v9, %v26_v8 }
  0x82   :  { %v37_v20 = vmul.f32 %v27_v9, %v27_v9  ;;  %vm53_vm2 = vcmp.ne.s32.totalorder %v52_v30, 0 }
  0x83   :  { %v30_v12 = vadd.f32 0.008332161, %v29_v10  ;;  %v39_v14 = vadd.f32 -0.0013887316, %v38_v11  ;;  %v36_v25 = vsub.f32 1.0, %v35_v16 }
  0x85   :  { %v31_v15 = vmul.f32 %v30_v12, %v27_v9  ;;  %v40_v17 = vmul.f32 %v39_v14, %v27_v9 }
  0x87   :  { %v32_v19 = vadd.f32 -0.16666655, %v31_v15  ;;  %v41_v21 = vadd.f32 0.041666646, %v40_v17 }
  0x89   :  { %v33_v23 = vmul.f32 %v32_v19, %v28_v18  ;;  %v42_v26 = vmul.f32 %v41_v21, %v37_v20 }
  0x8b   :  { %v34_v27 = vadd.f32 %v33_v23, %v26_v8  ;;  %v43_v28 = vadd.f32 %v42_v26, %v36_v25 }
  0x8d   :  { %v47_v31 = vsel %vm46_vm0, %v43_v28, %v34_v27  ;;  %v48_v32 = vsel %vm46_vm0, %v34_v27, %v43_v28 }
  0x8e   :  { %v54_v33 = vsub.f32 0.0, %v47_v31  ;;  %v56_v34 = vsub.f32 0.0, %v48_v32 }
  0x90   :  { %v55_v35 = vsel %vm50_vm1, %v54_v33, %v47_v31  ;;  %v57_v36 = vsel %vm53_vm2, %v56_v34, %v48_v32 }
  0x91   :  { %58 = vst [vmem:[#allocation2] sm:$0xff] %v55_v35 }
  0x92   :  { %59 = vst [vmem:[#allocation2 + $0x8] sm:$0xff] %v57_v36 }
  0x93   :  { %70 = dma.vmem_to_hbm [thread:$0]  %s66_s1, 256, %s68_s15, [#allocation3]  }
  0x94   :  { %106 = dma.done.wait [#allocation3], 256  }
  0x95   :  { %107 = vsyncadd [#allocation3], 4294967040 }
  0x96   :  { %75 = vsyncpa [#allocation3], 1 }

</bundles_post_ra>
